<compile_context>
chip_gen: v6e
topology: v6e:2x2x1
jax: 0.10.0
libtpu: 0.0.40
codegen_flags: <defaults>
</compile_context>

<pallas_src>
import functools

import jax
import jax.numpy as jnp
from jax.experimental import pallas as pl
from jax.experimental.pallas import tpu as pltpu


def _round_up(x: int, m: int) -> int:
    return ((x + m - 1) // m) * m


def _drop_path_kernel(scale_ref, x_ref, o_ref):
    # scale_ref: (N, 1) per-sample scale (0 or 1/keep_prob), already in x dtype.
    # x_ref / o_ref: (N, TILE_D) lane-dense tile of the flattened activation.
    o_ref[...] = x_ref[...] * scale_ref[...]


def drop_path(x: jax.Array, p: float, seed: int, training: bool = True) -> jax.Array:
    """Functional equivalent of epe_darts.ops.DropPath_ forward."""
    if (not training) or p <= 0.0:
        return x

    n, c, h, w = x.shape
    d = c * h * w
    keep_prob = 1.0 - float(p)

    # Per-sample Bernoulli mask -> scale, computed once on the host side of
    # the kernel (hoisted out of the per-tile body).
    key = jax.random.PRNGKey(seed)
    mask = jax.random.bernoulli(key, keep_prob, (n, 1))
    scale = (mask.astype(jnp.float32) * (1.0 / keep_prob)).astype(x.dtype)

    # Lane-dense, 128-multiple tiling over the flattened CHW axis.
    d_pad = _round_up(d, 128)
    tile_d = min(d_pad, 2048)          # a few KiB..MiB per block depending on N
    d_pad = _round_up(d_pad, tile_d)

    x2 = x.reshape(n, d)
    if d_pad != d:
        x2 = jnp.pad(x2, ((0, 0), (0, d_pad - d)))

    grid = (d_pad // tile_d,)
    itemsize = jnp.dtype(x.dtype).itemsize
    cost = pl.CostEstimate(
        flops=n * d_pad,
        transcendentals=0,
        bytes_accessed=2 * n * d_pad * itemsize + n * itemsize,
    )

    out = pl.pallas_call(
        _drop_path_kernel,
        out_shape=jax.ShapeDtypeStruct((n, d_pad), x.dtype),
        grid=grid,
        in_specs=[
            pl.BlockSpec((n, 1), lambda j: (0, 0)),        # per-sample scale
            pl.BlockSpec((n, tile_d), lambda j: (0, j)),   # x tile
        ],
        out_specs=pl.BlockSpec((n, tile_d), lambda j: (0, j)),
        input_output_aliases={1: 0},                        # in-place-style update
        compiler_params=pltpu.CompilerParams(
            dimension_semantics=("parallel",),
        ),
        cost_estimate=cost,
    )(scale, x2)

    if d_pad != d:
        out = out[:, :d]
    return out.reshape(n, c, h, w)


class DropPathPallas:
    """Mirror of the PyTorch DropPath_ module (stateless wrapper)."""

    def __init__(self, p: float = 0.0):
        self.p = p
        self.training = True

    def __call__(self, x: jax.Array, seed: int = 0) -> jax.Array:
        return drop_path(x, self.p, seed, training=self.training)


if __name__ == "__main__":
    import numpy as np

    key = jax.random.PRNGKey(0)
    x = jax.random.normal(key, (2, 4, 16, 16), dtype=jnp.float32)

    module = DropPathPallas(p=0.5)
    y = module(x, seed=42)
    y = jax.block_until_ready(y)

    # Sanity: each sample must be either all-zero or x / keep_prob exactly.
    keep_prob = 1.0 - module.p
    xn = np.asarray(x)
    yn = np.asarray(y)
    for i in range(xn.shape[0]):
        zeroed = np.allclose(yn[i], 0.0)
        scaled = np.allclose(yn[i], xn[i] / keep_prob, rtol=1e-5, atol=1e-5)
        assert zeroed or scaled, f"sample {i}: not a valid drop-path output"

    # Eval mode / p=0 are identity (no kernel needed).
    assert np.allclose(np.asarray(drop_path(x, 0.0, 0, training=True)), xn)
    assert np.allclose(np.asarray(drop_path(x, 0.5, 0, training=False)), xn)

    print("KERNEL_OK")
</pallas_src>

<mosaic_0001>
module attributes {stable_mosaic.version = 11 : i64} {
  func.func @_drop_path_kernel(%arg0: i32, %arg1: memref<2x1xf32, #tpu.memory_space<vmem>>, %arg2: memref<2x1024xf32, #tpu.memory_space<vmem>>, %arg3: memref<2x1024xf32, #tpu.memory_space<vmem>>) attributes {dimension_semantics = [#tpu.dimension_semantics<parallel>], iteration_bounds = array<i64: 1>, scalar_prefetch = 0 : i64, scratch_operands = 0 : i64, tpu.core_type = #tpu.core_type<tc>, window_params = [{pipeline_mode = #tpu.pipeline_mode<synchronous>, transform_indices = @transform_0, window_bounds = array<i64: 2, 1>}, {transform_indices = @transform_1, window_bounds = array<i64: 2, 1024>}, {transform_indices = @transform_2, window_bounds = array<i64: 2, 1024>}]} {
    %c0 = arith.constant 0 : index
    %c0_0 = arith.constant 0 : index
    %0 = vector.load %arg2[%c0, %c0_0] : memref<2x1024xf32, #tpu.memory_space<vmem>>, vector<2x1024xf32>
    %c0_1 = arith.constant 0 : index
    %c0_2 = arith.constant 0 : index
    %1 = vector.load %arg1[%c0_1, %c0_2] : memref<2x1xf32, #tpu.memory_space<vmem>>, vector<2x1xf32>
    %2 = vector.broadcast %1 : vector<2x1xf32> to vector<2x1024xf32>
    %3 = arith.mulf %0, %2 : vector<2x1024xf32>
    %c0_3 = arith.constant 0 : index
    %c0_4 = arith.constant 0 : index
    %4 = vector.load %arg3[%c0_3, %c0_4] : memref<2x1024xf32, #tpu.memory_space<vmem>>, vector<2x1024xf32>
    tpu.vector_store %arg3[%c0_3, %c0_4], %3 {strides = array<i32>} : memref<2x1024xf32, #tpu.memory_space<vmem>>, vector<2x1024xf32>,
    return
  }
  func.func @transform_0(%arg0: i32) -> (i32, i32) {
    %c0_i32 = arith.constant 0 : i32
    %c0_i32_0 = arith.constant 0 : i32
    %c0_i32_1 = arith.constant 0 : i32
    return %c0_i32, %c0_i32_0 : i32, i32
  }
  func.func @transform_1(%arg0: i32) -> (i32, i32) {
    %c0_i32 = arith.constant 0 : i32
    %c0_i32_0 = arith.constant 0 : i32
    return %c0_i32, %arg0 : i32, i32
  }
  func.func @transform_2(%arg0: i32) -> (i32, i32) {
    %c0_i32 = arith.constant 0 : i32
    %c0_i32_0 = arith.constant 0 : i32
    return %c0_i32, %arg0 : i32, i32
  }
}

</mosaic_0001>

<bundles_post_ra>
// kernel: tpu_custom_call.1
= control target key start
LH: loop header
LB: loop body
LE: loop exit
PB: predicated region body
PF: predicated region fallthrough
CT: control target
= control target key end

     0   :  { %7 = vsyncpa [#allocation3], 0  ;;  %s135_s0 = inlined_call_operand.vmem [shape: f32[2,1], index: 0, kind: input, shape index: {}]   ;;  %s136_s1 = inlined_call_operand.hbm [shape: f32[2,1024], index: 1, kind: input, shape index: {}, may-alias: {1,2}]   ;;  %s137_s2 = inlined_call_operand.hbm [shape: f32[2,1024], index: 2, kind: output, shape index: {}, may-alias: {1,2}]  }
   0x1   :  { %8 = vsyncpa [#allocation4], 0  ;;  %s107_s9 = smov [#allocation2]  }
   0x2   :  { %s17_s10 = sshll.u32 %s107_s9, 4  ;;  %s18_s10 = int_to_ptr.vmem [resolvable:$true] %s17_s10 }
   0x3   :  { %s71_s11 = scalar_lea.vmem %s18_s10, 256  ;;  %p76_p1 = scmp.lt.s32.totalorder %s18_s10, %s18_s10 }
   0x4   :  { %p72_p0 = scmp.ne.s32.totalorder %s18_s10, %s71_s11  ;;  %p77_p2 = scmp.lt.s32.totalorder %s71_s11, %s71_s11 }
   0x6   :  { %p78_p3 = por %p77_p2, %p76_p1 }
   0x8   :  { %p79_p4 = pnand %p78_p3, %p72_p0 }
   0xa   :  { %82 = shalt.err (!%p79_p4)
}
   0xb   :  { %20 = dma.hbm_to_vmem [thread:$0]  %s136_s1, 256, %s18_s10, [#allocation3]  }
   0xc   :  { %103 = dma.done.wait [#allocation3], 256  }
   0xd   :  { %104 = vsyncadd [#allocation3], 4294967040  ;;  %v108_v0 = vmov 0   ;;  %v26_v1 = vld [vmem:[%s135_s0] sm:$0x3]  ;;  %v34_v4 = vlaneseq  ;;  %v25_v10 = vld [vmem:[#allocation2 + $0x8] sm:$0xff] }
   0xe   :  { %62 = vset.pattern.permute.xlu0 %v108_v0  ;;  %v109_v2 = vmov 269488144   ;;  %v24_v9 = vld [vmem:[#allocation2] sm:$0xff]  ;;  %s110_s16 = smov [#allocation5]  }
   0xf   :  { %29 = vperm.xlu0 %62, %v26_v1   ;;  %v32_v3 = vunpack.c.l.s4 %v109_v2  ;;  %v35_v6 = vshrl.u32 %v34_v4, 7  ;;  %s49_s1 = sshll.u32 %s110_s16, 4  ;;  %s50_s1 = int_to_ptr.vmem [resolvable:$true] %s49_s1 }
  0x10   :  { %s83_s17 = scalar_lea.vmem %s50_s1, 256  ;;  %p88_p6 = scmp.lt.s32.totalorder %s50_s1, %s50_s1 }
  0x11   :  { %v33_v5 = vunpack.c.0.s8 %v32_v3  ;;  %p84_p5 = scmp.ne.s32.totalorder %s50_s1, %s83_s17  ;;  %p89_p7 = scmp.lt.s32.totalorder %s83_s17, %s83_s17 }
  0x13   :  { %v36_v7 = vsub.s32 %v33_v5, %v35_v6  ;;  %p90_p8 = por %p89_p7, %p88_p6 }
  0x15   :  { %p91_p9 = pnand %p90_p8, %p84_p5 }
  0x8a   :  { %v30_v8 = vpop.permute.xlu0 %29 }
  0x8b   :  { %v37_v11 = vrot.slane %v30_v8, %v36_v7 }
  0x8d   :  { %v39_v12 = vmul.f32 %v37_v11, %v24_v9  ;;  %v40_v13 = vmul.f32 %v37_v11, %v25_v10 }
  0x8f   :  { %41 = vst [vmem:[#allocation5] sm:$0xff] %v39_v12  ;;  %42 = vst [vmem:[#allocation5 + $0x8] sm:$0xff] %v40_v13 }
  0x90   :  { %94 = shalt.err (!%p91_p9)
}
  0x91   :  { %52 = dma.vmem_to_hbm [thread:$0]  %s50_s1, 256, %s137_s2, [#allocation4]  }
  0x92   :  { %105 = dma.done.wait [#allocation4], 256  }
  0x93   :  { %106 = vsyncadd [#allocation4], 4294967040 }
  0x94   :  { %56 = vsyncpa [#allocation3], 1 }
  0x95   :  { %57 = vsyncpa [#allocation4], 1 }

</bundles_post_ra>
